<compile_context>
chip_gen: v5e
topology: v5e:2x2
jax: 0.10.0
libtpu: 0.0.40
codegen_flags: <defaults>
</compile_context>

<pallas_src>
import jax
import jax.numpy as jnp
from jax.experimental import pallas as pl
from jax.experimental.pallas import tpu as pltpu

IN_FEAT = 256
CAT_FEAT = 4 * IN_FEAT          # 1024
H1, H2, H3, OUT = 32, 64, 128, 4


def _round_up(x, m):
    return ((x + m - 1) // m) * m


def _mlp_kernel(x0_ref, x1_ref, x2_ref, x3_ref,
                w1_ref, w2_ref, w3_ref, w4_ref, o_ref):
    # Layer 1 as split-K over the four concatenated feature blocks
    # (concat order from the PyTorch module: [r_src, t_src, r_ref, t_ref]):
    #   h1 = x0 @ w1[0:256] + x1 @ w1[256:512] + x2 @ w1[512:768] + x3 @ w1[768:1024]
    # x*/w1 may be bf16; accumulate in f32 on the MXU.
    h1 = jnp.dot(x0_ref[...], w1_ref[0 * IN_FEAT:1 * IN_FEAT, :],
                 preferred_element_type=jnp.float32)
    h1 += jnp.dot(x1_ref[...], w1_ref[1 * IN_FEAT:2 * IN_FEAT, :],
                  preferred_element_type=jnp.float32)
    h1 += jnp.dot(x2_ref[...], w1_ref[2 * IN_FEAT:3 * IN_FEAT, :],
                  preferred_element_type=jnp.float32)
    h1 += jnp.dot(x3_ref[...], w1_ref[3 * IN_FEAT:4 * IN_FEAT, :],
                  preferred_element_type=jnp.float32)
    h = jnp.maximum(h1, 0.0)
    # Layers 2-4: tiny f32 matmuls on VMEM-resident weights.
    h = jnp.maximum(jnp.dot(h, w2_ref[...], preferred_element_type=jnp.float32), 0.0)
    h = jnp.maximum(jnp.dot(h, w3_ref[...], preferred_element_type=jnp.float32), 0.0)
    h = jnp.maximum(jnp.dot(h, w4_ref[...], preferred_element_type=jnp.float32), 0.0)
    o_ref[...] = h.astype(o_ref.dtype)


def rot_reg_branch_pallas(x0, x1, x2, x3, w1, w2, w3, w4, *,
                          tm=2048, compute_dtype=jnp.bfloat16,
                          input_buffering=None):
    """Fused 4-layer MLP.

    x0..x3: (M, 256) feature streams in concat order [r_src, t_src, r_ref, t_ref].
    w1: (1024, 32), w2: (32, 64), w3: (64, 128), w4: (128, 4)  -- (in, out) layout.
    tm: row tile (sweep knob).  2048 bf16 -> ~8 MiB of double-buffered inputs,
        safe under v5e's 16 MiB / v6e/v7x 32 MiB default scoped VMEM (we also
        raise vmem_limit_bytes to 48 MiB for the f32 path).
    compute_dtype: dtype the x streams / w1 are fed (and multiplied) in;
        bf16 halves HBM traffic.  If the producer already emits bf16 the cast
        here is a no-op; otherwise XLA typically fuses it upstream.
    input_buffering: optional buffer count (e.g. 3) for the x-stream pipeline
        on v7x; None keeps the default double-buffering.
    """
    M = x0.shape[0]
    assert x0.shape == x1.shape == x2.shape == x3.shape == (M, IN_FEAT)
    assert w1.shape == (CAT_FEAT, H1)
    assert w2.shape == (H1, H2) and w3.shape == (H2, H3) and w4.shape == (H3, OUT)

    xs = [x.astype(compute_dtype) for x in (x0, x1, x2, x3)]
    w1 = w1.astype(compute_dtype)
    w2, w3, w4 = (w.astype(jnp.float32) for w in (w2, w3, w4))

    # Effective tile: never larger than (8-rounded) M, always a multiple of 8.
    tm_eff = _round_up(min(tm, _round_up(M, 8)), 8)
    grid = (pl.cdiv(M, tm_eff),)          # partial last block; no jnp.pad copy

    x_kwargs = {}
    if input_buffering is not None:
        x_kwargs = dict(pipeline_mode=pl.Buffered(input_buffering))
    x_spec = pl.BlockSpec((tm_eff, IN_FEAT), lambda i: (i, 0), **x_kwargs)

    def w_spec(shape):
        # Constant index_map -> weights stay resident in VMEM across the grid.
        return pl.BlockSpec(shape, lambda i: (0, 0))

    x_bytes = jnp.dtype(compute_dtype).itemsize
    flops_per_row = 2 * (CAT_FEAT * H1 + H1 * H2 + H2 * H3 + H3 * OUT)  # 87040
    cost = pl.CostEstimate(
        flops=M * flops_per_row,
        transcendentals=0,
        bytes_accessed=(4 * M * IN_FEAT * x_bytes            # input streams
                        + M * OUT * 4                         # output
                        + CAT_FEAT * H1 * x_bytes             # w1
                        + 4 * (H1 * H2 + H2 * H3 + H3 * OUT)))  # w2..w4

    out = pl.pallas_call(
        _mlp_kernel,
        out_shape=jax.ShapeDtypeStruct((M, OUT), jnp.float32),
        grid_spec=pltpu.PrefetchScalarGridSpec(
            num_scalar_prefetch=0,
            grid=grid,
            in_specs=[
                x_spec, x_spec, x_spec, x_spec,
                w_spec((CAT_FEAT, H1)),
                w_spec((H1, H2)),
                w_spec((H2, H3)),
                w_spec((H3, OUT)),
            ],
            out_specs=pl.BlockSpec((tm_eff, OUT), lambda i: (i, 0)),
        ),
        compiler_params=pltpu.CompilerParams(
            dimension_semantics=("parallel",),
            vmem_limit_bytes=48 * 1024 * 1024),
        cost_estimate=cost,
    )(*xs, w1, w2, w3, w4)
    return out


def rot_reg_branch(r_source, r_reference, t_source, t_reference, params, *,
                   tm=2048, compute_dtype=jnp.bfloat16, input_buffering=None):
    """Matches RotRegBranch.forward(r_source, r_reference, t_source, t_reference).

    NOTE: the internal concat order (per the PyTorch module's torch.cat) is
    [r_source, t_source, r_reference, t_reference] -- NOT the argument order.
    Inputs: (B, S, 256) each. Output: (B, S, 4) float32.
    """
    B, S, F = r_source.shape
    assert F == IN_FEAT
    flat = lambda x: x.reshape(B * S, IN_FEAT)   # contiguous reshape: free view
    out = rot_reg_branch_pallas(
        flat(r_source), flat(t_source), flat(r_reference), flat(t_reference),
        *params, tm=tm, compute_dtype=compute_dtype,
        input_buffering=input_buffering)
    return out.reshape(B, S, OUT)


def init_params(key):
    """Kaiming-uniform-like init (PyTorch Linear default, no bias).
    Weights stored as (in_features, out_features) so the kernel does x @ W."""
    dims = [(CAT_FEAT, H1), (H1, H2), (H2, H3), (H3, OUT)]
    params = []
    for i, (fin, fout) in enumerate(dims):
        k = jax.random.fold_in(key, i)
        bound = 1.0 / jnp.sqrt(fin)
        w = jax.random.uniform(k, (fin, fout), jnp.float32, -bound, bound)
        params.append(w)
    return tuple(params)


def _reference(r_src, r_ref, t_src, t_ref, params):
    # Pure-f32 JAX reference replicating the PyTorch module's concat order.
    cat = jnp.concatenate([r_src, t_src, r_ref, t_ref], axis=2)
    h = cat
    for w in params:
        h = jnp.maximum(h @ w, 0.0)
    return h


if __name__ == "__main__":
    key = jax.random.PRNGKey(0)
    kp, k1, k2, k3, k4 = jax.random.split(key, 5)
    params = init_params(kp)

    # --- Test 1: default bf16 path, small demo shape (single grid step). ---
    B, S = 2, 8
    r_src = jax.random.normal(k1, (B, S, IN_FEAT), jnp.float32)
    r_ref = jax.random.normal(k2, (B, S, IN_FEAT), jnp.float32)
    t_src = jax.random.normal(k3, (B, S, IN_FEAT), jnp.float32)
    t_ref = jax.random.normal(k4, (B, S, IN_FEAT), jnp.float32)

    out = rot_reg_branch(r_src, r_ref, t_src, t_ref, params)
    jax.block_until_ready(out)
    ref = _reference(r_src, r_ref, t_src, t_ref, params)
    assert out.shape == (B, S, OUT)
    assert jnp.allclose(out, ref, atol=3e-2, rtol=3e-2), \
        float(jnp.abs(out - ref).max())

    # --- Test 2: exact f32 path, M=15 not a multiple of the tile -> exercises
    # the partial last block (no padding copy) and a >1-step grid. ---
    B2, S2 = 3, 5
    ks = jax.random.split(jax.random.fold_in(key, 99), 4)
    r_src2 = jax.random.normal(ks[0], (B2, S2, IN_FEAT), jnp.float32)
    r_ref2 = jax.random.normal(ks[1], (B2, S2, IN_FEAT), jnp.float32)
    t_src2 = jax.random.normal(ks[2], (B2, S2, IN_FEAT), jnp.float32)
    t_ref2 = jax.random.normal(ks[3], (B2, S2, IN_FEAT), jnp.float32)

    out2 = rot_reg_branch(r_src2, r_ref2, t_src2, t_ref2, params,
                          tm=8, compute_dtype=jnp.float32)
    jax.block_until_ready(out2)
    ref2 = _reference(r_src2, r_ref2, t_src2, t_ref2, params)
    assert out2.shape == (B2, S2, OUT)
    assert jnp.allclose(out2, ref2, atol=1e-4, rtol=1e-5), \
        float(jnp.abs(out2 - ref2).max())

    # --- Test 3: bf16 path with a partial last block (ragged M). ---
    out3 = rot_reg_branch(r_src2, r_ref2, t_src2, t_ref2, params, tm=8)
    jax.block_until_ready(out3)
    assert out3.shape == (B2, S2, OUT)
    assert jnp.allclose(out3, ref2, atol=3e-2, rtol=3e-2), \
        float(jnp.abs(out3 - ref2).max())

    print("KERNEL_OK")
</pallas_src>

<mosaic_0001>
module attributes {stable_mosaic.version = 11 : i64} {
  func.func @_mlp_kernel(%arg0: i32, %arg1: memref<16x256xbf16, #tpu.memory_space<vmem>>, %arg2: memref<16x256xbf16, #tpu.memory_space<vmem>>, %arg3: memref<16x256xbf16, #tpu.memory_space<vmem>>, %arg4: memref<16x256xbf16, #tpu.memory_space<vmem>>, %arg5: memref<1024x32xbf16, #tpu.memory_space<vmem>>, %arg6: memref<32x64xf32, #tpu.memory_space<vmem>>, %arg7: memref<64x128xf32, #tpu.memory_space<vmem>>, %arg8: memref<128x4xf32, #tpu.memory_space<vmem>>, %arg9: memref<16x4xf32, #tpu.memory_space<vmem>>) attributes {dimension_semantics = [#tpu.dimension_semantics<parallel>], iteration_bounds = array<i64: 1>, scalar_prefetch = 0 : i64, scratch_operands = 0 : i64, tpu.core_type = #tpu.core_type<tc>, window_params = [{transform_indices = @transform_0, window_bounds = array<i64: 16, 256>}, {transform_indices = @transform_1, window_bounds = array<i64: 16, 256>}, {transform_indices = @transform_2, window_bounds = array<i64: 16, 256>}, {transform_indices = @transform_3, window_bounds = array<i64: 16, 256>}, {pipeline_mode = #tpu.pipeline_mode<synchronous>, transform_indices = @transform_4, window_bounds = array<i64: 1024, 32>}, {pipeline_mode = #tpu.pipeline_mode<synchronous>, transform_indices = @transform_5, window_bounds = array<i64: 32, 64>}, {pipeline_mode = #tpu.pipeline_mode<synchronous>, transform_indices = @transform_6, window_bounds = array<i64: 64, 128>}, {pipeline_mode = #tpu.pipeline_mode<synchronous>, transform_indices = @transform_7, window_bounds = array<i64: 128, 4>}, {transform_indices = @transform_8, window_bounds = array<i64: 16, 4>}]} {
    %c0 = arith.constant 0 : index
    %c0_0 = arith.constant 0 : index
    %0 = vector.load %arg1[%c0, %c0_0] : memref<16x256xbf16, #tpu.memory_space<vmem>>, vector<16x256xbf16>
    %c0_1 = arith.constant 0 : index
    %c0_2 = arith.constant 0 : index
    %1 = vector.load %arg5[%c0_1, %c0_2] : memref<1024x32xbf16, #tpu.memory_space<vmem>>, vector<256x32xbf16>
    %cst = arith.constant dense<0.000000e+00> : vector<16x32xf32>
    %2 = tpu.matmul %0, %1, %cst {dimension_numbers = #tpu.dot_dimension_numbers<[1], [0], [0], [1], [0, 0, 1, 1], [], []>} : vector<16x256xbf16>, vector<256x32xbf16>, vector<16x32xf32> -> vector<16x32xf32>
    %c0_3 = arith.constant 0 : index
    %c0_4 = arith.constant 0 : index
    %3 = vector.load %arg2[%c0_3, %c0_4] : memref<16x256xbf16, #tpu.memory_space<vmem>>, vector<16x256xbf16>
    %c256 = arith.constant 256 : index
    %c0_5 = arith.constant 0 : index
    %4 = vector.load %arg5[%c256, %c0_5] : memref<1024x32xbf16, #tpu.memory_space<vmem>>, vector<256x32xbf16>
    %cst_6 = arith.constant dense<0.000000e+00> : vector<16x32xf32>
    %5 = tpu.matmul %3, %4, %cst_6 {dimension_numbers = #tpu.dot_dimension_numbers<[1], [0], [0], [1], [0, 0, 1, 1], [], []>} : vector<16x256xbf16>, vector<256x32xbf16>, vector<16x32xf32> -> vector<16x32xf32>
    %6 = arith.addf %2, %5 : vector<16x32xf32>
    %c0_7 = arith.constant 0 : index
    %c0_8 = arith.constant 0 : index
    %7 = vector.load %arg3[%c0_7, %c0_8] : memref<16x256xbf16, #tpu.memory_space<vmem>>, vector<16x256xbf16>
    %c512 = arith.constant 512 : index
    %c0_9 = arith.constant 0 : index
    %8 = vector.load %arg5[%c512, %c0_9] : memref<1024x32xbf16, #tpu.memory_space<vmem>>, vector<256x32xbf16>
    %cst_10 = arith.constant dense<0.000000e+00> : vector<16x32xf32>
    %9 = tpu.matmul %7, %8, %cst_10 {dimension_numbers = #tpu.dot_dimension_numbers<[1], [0], [0], [1], [0, 0, 1, 1], [], []>} : vector<16x256xbf16>, vector<256x32xbf16>, vector<16x32xf32> -> vector<16x32xf32>
    %10 = arith.addf %6, %9 : vector<16x32xf32>
    %c0_11 = arith.constant 0 : index
    %c0_12 = arith.constant 0 : index
    %11 = vector.load %arg4[%c0_11, %c0_12] : memref<16x256xbf16, #tpu.memory_space<vmem>>, vector<16x256xbf16>
    %c768 = arith.constant 768 : index
    %c0_13 = arith.constant 0 : index
    %12 = vector.load %arg5[%c768, %c0_13] : memref<1024x32xbf16, #tpu.memory_space<vmem>>, vector<256x32xbf16>
    %cst_14 = arith.constant dense<0.000000e+00> : vector<16x32xf32>
    %13 = tpu.matmul %11, %12, %cst_14 {dimension_numbers = #tpu.dot_dimension_numbers<[1], [0], [0], [1], [0, 0, 1, 1], [], []>} : vector<16x256xbf16>, vector<256x32xbf16>, vector<16x32xf32> -> vector<16x32xf32>
    %14 = arith.addf %10, %13 : vector<16x32xf32>
    %cst_15 = arith.constant 0.000000e+00 : f32
    %15 = vector.broadcast %cst_15 : f32 to vector<16x32xf32>
    %16 = arith.maximumf %14, %15 : vector<16x32xf32>
    %c0_16 = arith.constant 0 : index
    %c0_17 = arith.constant 0 : index
    %17 = vector.load %arg6[%c0_16, %c0_17] : memref<32x64xf32, #tpu.memory_space<vmem>>, vector<32x64xf32>
    %cst_18 = arith.constant dense<0.000000e+00> : vector<16x64xf32>
    %18 = tpu.matmul %16, %17, %cst_18 {dimension_numbers = #tpu.dot_dimension_numbers<[1], [0], [0], [1], [0, 0, 1, 1], [], []>} : vector<16x32xf32>, vector<32x64xf32>, vector<16x64xf32> -> vector<16x64xf32>
    %cst_19 = arith.constant 0.000000e+00 : f32
    %19 = vector.broadcast %cst_19 : f32 to vector<16x64xf32>
    %20 = arith.maximumf %18, %19 : vector<16x64xf32>
    %c0_20 = arith.constant 0 : index
    %c0_21 = arith.constant 0 : index
    %21 = vector.load %arg7[%c0_20, %c0_21] : memref<64x128xf32, #tpu.memory_space<vmem>>, vector<64x128xf32>
    %cst_22 = arith.constant dense<0.000000e+00> : vector<16x128xf32>
    %22 = tpu.matmul %20, %21, %cst_22 {dimension_numbers = #tpu.dot_dimension_numbers<[1], [0], [0], [1], [0, 0, 1, 1], [], []>} : vector<16x64xf32>, vector<64x128xf32>, vector<16x128xf32> -> vector<16x128xf32>
    %cst_23 = arith.constant 0.000000e+00 : f32
    %23 = vector.broadcast %cst_23 : f32 to vector<16x128xf32>
    %24 = arith.maximumf %22, %23 : vector<16x128xf32>
    %c0_24 = arith.constant 0 : index
    %c0_25 = arith.constant 0 : index
    %25 = vector.load %arg8[%c0_24, %c0_25] : memref<128x4xf32, #tpu.memory_space<vmem>>, vector<128x4xf32>
    %cst_26 = arith.constant dense<0.000000e+00> : vector<16x4xf32>
    %26 = tpu.matmul %24, %25, %cst_26 {dimension_numbers = #tpu.dot_dimension_numbers<[1], [0], [0], [1], [0, 0, 1, 1], [], []>} : vector<16x128xf32>, vector<128x4xf32>, vector<16x4xf32> -> vector<16x4xf32>
    %cst_27 = arith.constant 0.000000e+00 : f32
    %27 = vector.broadcast %cst_27 : f32 to vector<16x4xf32>
    %28 = arith.maximumf %26, %27 : vector<16x4xf32>
    %c0_28 = arith.constant 0 : index
    %c0_29 = arith.constant 0 : index
    %29 = vector.load %arg9[%c0_28, %c0_29] : memref<16x4xf32, #tpu.memory_space<vmem>>, vector<16x4xf32>
    tpu.vector_store %arg9[%c0_28, %c0_29], %28 {strides = array<i32>} : memref<16x4xf32, #tpu.memory_space<vmem>>, vector<16x4xf32>,
    return
  }
  func.func @transform_0(%arg0: i32) -> (i32, i32) {
    %c0_i32 = arith.constant 0 : i32
    %c0_i32_0 = arith.constant 0 : i32
    return %arg0, %c0_i32 : i32, i32
  }
  func.func @transform_1(%arg0: i32) -> (i32, i32) {
    %c0_i32 = arith.constant 0 : i32
    %c0_i32_0 = arith.constant 0 : i32
    return %arg0, %c0_i32 : i32, i32
  }
  func.func @transform_2(%arg0: i32) -> (i32, i32) {
    %c0_i32 = arith.constant 0 : i32
    %c0_i32_0 = arith.constant 0 : i32
    return %arg0, %c0_i32 : i32, i32
  }
  func.func @transform_3(%arg0: i32) -> (i32, i32) {
    %c0_i32 = arith.constant 0 : i32
    %c0_i32_0 = arith.constant 0 : i32
    return %arg0, %c0_i32 : i32, i32
  }
  func.func @transform_4(%arg0: i32) -> (i32, i32) {
    %c0_i32 = arith.constant 0 : i32
    %c0_i32_0 = arith.constant 0 : i32
    %c0_i32_1 = arith.constant 0 : i32
    return %c0_i32, %c0_i32_0 : i32, i32
  }
  func.func @transform_5(%arg0: i32) -> (i32, i32) {
    %c0_i32 = arith.constant 0 : i32
    %c0_i32_0 = arith.constant 0 : i32
    %c0_i32_1 = arith.constant 0 : i32
    return %c0_i32, %c0_i32_0 : i32, i32
  }
  func.func @transform_6(%arg0: i32) -> (i32, i32) {
    %c0_i32 = arith.constant 0 : i32
    %c0_i32_0 = arith.constant 0 : i32
    %c0_i32_1 = arith.constant 0 : i32
    return %c0_i32, %c0_i32_0 : i32, i32
  }
  func.func @transform_7(%arg0: i32) -> (i32, i32) {
    %c0_i32 = arith.constant 0 : i32
    %c0_i32_0 = arith.constant 0 : i32
    %c0_i32_1 = arith.constant 0 : i32
    return %c0_i32, %c0_i32_0 : i32, i32
  }
  func.func @transform_8(%arg0: i32) -> (i32, i32) {
    %c0_i32 = arith.constant 0 : i32
    %c0_i32_0 = arith.constant 0 : i32
    return %arg0, %c0_i32 : i32, i32
  }
}

</mosaic_0001>

<bundles_post_ra>
// kernel: tpu_custom_call.1
= control target key start
LH: loop header
LB: loop body
LE: loop exit
PB: predicated region body
PF: predicated region fallthrough
CT: control target
= control target key end

     0   :  { %vm711_vm0 = vcmask 261120   ;;  %vm751_vm1 = vcmask 523264   ;;  %vm824_vm2 = vcmask 31744   ;;  %s1586_s4 = inlined_call_operand.vmem [shape: bf16[1024,32], index: 4, kind: input, shape index: {}]   ;;  %s1587_s0 = inlined_call_operand.vmem [shape: bf16[16,256], index: 0, kind: input, shape index: {}]   ;;  %s1588_s1 = inlined_call_operand.vmem [shape: bf16[16,256], index: 1, kind: input, shape index: {}]   ;;  %s1589_s2 = inlined_call_operand.vmem [shape: bf16[16,256], index: 2, kind: input, shape index: {}]   ;;  %s1590_s3 = inlined_call_operand.vmem [shape: bf16[16,256], index: 3, kind: input, shape index: {}]   ;;  %s1591_s5 = inlined_call_operand.vmem [shape: f32[32,64], index: 5, kind: input, shape index: {}]   ;;  %s1592_s6 = inlined_call_operand.vmem [shape: f32[64,128], index: 6, kind: input, shape index: {}]   ;;  %s1593_s7 = inlined_call_operand.vmem [shape: f32[128,4], index: 7, kind: input, shape index: {}]   ;;  %s1594_s8 = inlined_call_operand.vmem [shape: f32[16,4], index: 8, kind: output, shape index: {}]  }
   0x1   :  { %v1150_v0 = vld [vmem:[%s1586_s4 + $0xb8] sm:$0xff]  ;;  %v1149_v4 = vld [vmem:[%s1586_s4 + $0xb0] sm:$0xff]  ;;  %v1148_v8 = vld [vmem:[%s1586_s4 + $0xa8] sm:$0xff] }
   0x2   :  { %v1158_v1 = vld [vmem:[%s1586_s4 + $0xf8] sm:$0xff]  ;;  %203 = vmatpush.bf16.msra.mxu0 %v1150_v0  ;;  %v1157_v5 = vld [vmem:[%s1586_s4 + $0xf0] sm:$0xff]  ;;  %v1156_v9 = vld [vmem:[%s1586_s4 + $0xe8] sm:$0xff] }
   0x3   :  { %v1132_v2 = vld [vmem:[%s1586_s4 + $0x38] sm:$0xff]  ;;  %217 = vmatpush.bf16.msra.mxu1 %v1158_v1  ;;  %v1131_v6 = vld [vmem:[%s1586_s4 + $0x30] sm:$0xff]  ;;  %v1130_v10 = vld [vmem:[%s1586_s4 + $0x28] sm:$0xff] }
   0x4   :  { %v1140_v3 = vld [vmem:[%s1586_s4 + $0x78] sm:$0xff]  ;;  %337 = vmatpush.bf16.msra.mxu2 %v1132_v2  ;;  %v1139_v7 = vld [vmem:[%s1586_s4 + $0x70] sm:$0xff]  ;;  %v1138_v11 = vld [vmem:[%s1586_s4 + $0x68] sm:$0xff] }
   0x5   :  { %351 = vmatpush.bf16.msra.mxu3 %v1140_v3  ;;  %v1147_v12 = vld [vmem:[%s1586_s4 + $0xa0] sm:$0xff]  ;;  %v1146_v16 = vld [vmem:[%s1586_s4 + $0x98] sm:$0xff]  ;;  %v1145_v20 = vld [vmem:[%s1586_s4 + $0x90] sm:$0xff] }
   0x6   :  { %204 = vmatpush.bf16.msra.mxu0 %v1149_v4  ;;  %v1155_v13 = vld [vmem:[%s1586_s4 + $0xe0] sm:$0xff]  ;;  %v1154_v17 = vld [vmem:[%s1586_s4 + $0xd8] sm:$0xff]  ;;  %v1153_v21 = vld [vmem:[%s1586_s4 + $0xd0] sm:$0xff] }
   0x7   :  { %218 = vmatpush.bf16.msra.mxu1 %v1157_v5  ;;  %v1129_v14 = vld [vmem:[%s1586_s4 + $0x20] sm:$0xff]  ;;  %v1128_v18 = vld [vmem:[%s1586_s4 + $0x18] sm:$0xff]  ;;  %v1127_v22 = vld [vmem:[%s1586_s4 + $0x10] sm:$0xff] }
   0x8   :  { %338 = vmatpush.bf16.msra.mxu2 %v1131_v6  ;;  %v1137_v15 = vld [vmem:[%s1586_s4 + $0x60] sm:$0xff]  ;;  %v1136_v19 = vld [vmem:[%s1586_s4 + $0x58] sm:$0xff]  ;;  %v1135_v23 = vld [vmem:[%s1586_s4 + $0x50] sm:$0xff] }
   0x9   :  { %352 = vmatpush.bf16.msra.mxu3 %v1139_v7  ;;  %v1144_v24 = vld [vmem:[%s1586_s4 + $0x88] sm:$0xff]  ;;  %v1143_v28 = vld [vmem:[%s1586_s4 + $0x80] sm:$0xff]  ;;  %v1168_v32 = vld [vmem:[%s1586_s4 + $0x138] sm:$0xff] }
   0xa   :  { %205 = vmatpush.bf16.msra.mxu0 %v1148_v8  ;;  %v1152_v25 = vld [vmem:[%s1586_s4 + $0xc8] sm:$0xff]  ;;  %v1151_v29 = vld [vmem:[%s1586_s4 + $0xc0] sm:$0xff]  ;;  %v1176_v33 = vld [vmem:[%s1586_s4 + $0x178] sm:$0xff] }
   0xb   :  { %219 = vmatpush.bf16.msra.mxu1 %v1156_v9  ;;  %v1126_v26 = vld [vmem:[%s1586_s4 + $0x8] sm:$0xff]  ;;  %v1125_v30 = vld [vmem:[%s1586_s4] sm:$0xff]  ;;  %v1186_v42 = vld [vmem:[%s1586_s4 + $0x1b8] sm:$0xff] }
   0xc   :  { %339 = vmatpush.bf16.msra.mxu2 %v1130_v10  ;;  %v1134_v27 = vld [vmem:[%s1586_s4 + $0x48] sm:$0xff]  ;;  %v1133_v31 = vld [vmem:[%s1586_s4 + $0x40] sm:$0xff]  ;;  %v1194_v43 = vld [vmem:[%s1586_s4 + $0x1f8] sm:$0xff] }
   0xd   :  { %353 = vmatpush.bf16.msra.mxu3 %v1138_v11  ;;  %v905_v34 = vld [vmem:[%s1587_s0] sm:$0xf]  ;;  %v1124_v35 = vld [vmem:[%s1587_s0 + $0x4] sm:$0xf0]  ;;  %v1123_v36 = vld [vmem:[%s1587_s0 + $0x4] sm:$0xf] }
   0xe   :  { %206 = vmatpush.bf16.msra.mxu0 %v1147_v12  ;;  %v907_v37 = vld [vmem:[%s1587_s0 + $0x8] sm:$0xf0]  ;;  %v833_v38 = vld [vmem:[%s1588_s1] sm:$0xf]  ;;  %v1142_v39 = vld [vmem:[%s1588_s1 + $0x4] sm:$0xf0]  ;;  %v906_v44 = vor.u32 %v1124_v35, %v905_v34 }
   0xf   :  { %220 = vmatpush.bf16.msra.mxu1 %v1155_v13  ;;  %v1141_v40 = vld [vmem:[%s1588_s1 + $0x4] sm:$0xf]  ;;  %v835_v41 = vld [vmem:[%s1588_s1 + $0x8] sm:$0xf0]  ;;  %v910_v45 = vor.u32 %v1123_v36, %v907_v37  ;;  %v834_v46 = vor.u32 %v1142_v39, %v833_v38  ;;  %v1167_v48 = vld [vmem:[%s1586_s4 + $0x130] sm:$0xff] }
  0x10   :  { %340 = vmatpush.bf16.msra.mxu2 %v1129_v14  ;;  %v838_v47 = vor.u32 %v1141_v40, %v835_v41  ;;  %v1175_v49 = vld [vmem:[%s1586_s4 + $0x170] sm:$0xff]  ;;  %v1166_v52 = vld [vmem:[%s1586_s4 + $0x128] sm:$0xff]  ;;  %v1165_v56 = vld [vmem:[%s1586_s4 + $0x120] sm:$0xff] }
  0x11   :  { %354 = vmatpush.bf16.msra.mxu3 %v1137_v15  ;;  %v1185_v50 = vld [vmem:[%s1586_s4 + $0x1b0] sm:$0xff]  ;;  %v1174_v53 = vld [vmem:[%s1586_s4 + $0x168] sm:$0xff]  ;;  %v1173_v57 = vld [vmem:[%s1586_s4 + $0x160] sm:$0xff] }
  0x12   :  { %207 = vmatpush.bf16.msra.mxu0 %v1146_v16  ;;  %v1193_v51 = vld [vmem:[%s1586_s4 + $0x1f0] sm:$0xff]  ;;  %v1184_v54 = vld [vmem:[%s1586_s4 + $0x1a8] sm:$0xff]  ;;  %v1183_v58 = vld [vmem:[%s1586_s4 + $0x1a0] sm:$0xff] }
  0x13   :  { %221 = vmatpush.bf16.msra.mxu1 %v1154_v17  ;;  %v1192_v55 = vld [vmem:[%s1586_s4 + $0x1e8] sm:$0xff]  ;;  %v1191_v59 = vld [vmem:[%s1586_s4 + $0x1e0] sm:$0xff]  ;;  %v1164_v60 = vld [vmem:[%s1586_s4 + $0x118] sm:$0xff] }
  0x14   :  { %341 = vmatpush.bf16.msra.mxu2 %v1128_v18  ;;  %v1172_v61 = vld [vmem:[%s1586_s4 + $0x158] sm:$0xff]  ;;  %v1163_v0 = vld [vmem:[%s1586_s4 + $0x110] sm:$0xff]  ;;  %v1162_v4 = vld [vmem:[%s1586_s4 + $0x108] sm:$0xff] }
  0x15   :  { %355 = vmatpush.bf16.msra.mxu3 %v1136_v19  ;;  %v1182_v62 = vld [vmem:[%s1586_s4 + $0x198] sm:$0xff]  ;;  %v1171_v1 = vld [vmem:[%s1586_s4 + $0x150] sm:$0xff]  ;;  %v1170_v5 = vld [vmem:[%s1586_s4 + $0x148] sm:$0xff] }
  0x16   :  { %208 = vmatpush.bf16.msra.mxu0 %v1145_v20  ;;  %v1190_v63 = vld [vmem:[%s1586_s4 + $0x1d8] sm:$0xff]  ;;  %v1181_v2 = vld [vmem:[%s1586_s4 + $0x190] sm:$0xff]  ;;  %v1180_v6 = vld [vmem:[%s1586_s4 + $0x188] sm:$0xff] }
  0x17   :  { %222 = vmatpush.bf16.msra.mxu1 %v1153_v21  ;;  %v1189_v3 = vld [vmem:[%s1586_s4 + $0x1d0] sm:$0xff]  ;;  %v1188_v7 = vld [vmem:[%s1586_s4 + $0x1c8] sm:$0xff]  ;;  %v1161_v8 = vld [vmem:[%s1586_s4 + $0x100] sm:$0xff] }
  0x18   :  { %342 = vmatpush.bf16.msra.mxu2 %v1127_v22  ;;  %v1169_v9 = vld [vmem:[%s1586_s4 + $0x140] sm:$0xff]  ;;  %v1160_v13 = vld [vmem:[%s1589_s2 + $0x4] sm:$0xf0]  ;;  %v979_v15 = vld [vmem:[%s1589_s2 + $0x8] sm:$0xf0] }
  0x19   :  { %356 = vmatpush.bf16.msra.mxu3 %v1135_v23  ;;  %v1179_v10 = vld [vmem:[%s1586_s4 + $0x180] sm:$0xff]  ;;  %v1178_v17 = vld [vmem:[%s1590_s3 + $0x4] sm:$0xf0]  ;;  %v1051_v19 = vld [vmem:[%s1590_s3 + $0x8] sm:$0xf0] }
  0x1a   :  { %209 = vmatpush.bf16.msra.mxu0 %v1144_v24  ;;  %v1187_v11 = vld [vmem:[%s1586_s4 + $0x1c0] sm:$0xff]  ;;  %v710_v24 = vld [vmem:[%s1591_s5 + $0x18] sm:$0xff]  ;;  %v748_v36 = vld [vmem:[%s1592_s6 + $0x28] sm:$0xff] }
  0x1b   :  { %223 = vmatpush.bf16.msra.mxu1 %v1152_v25  ;;  %v977_v12 = vld [vmem:[%s1589_s2] sm:$0xf]  ;;  %v1159_v14 = vld [vmem:[%s1589_s2 + $0x4] sm:$0xf]  ;;  %v709_v25 = vld [vmem:[%s1591_s5 + $0x10] sm:$0xff] }
  0x1c   :  { %343 = vmatpush.bf16.msra.mxu2 %v1126_v26  ;;  %v1049_v16 = vld [vmem:[%s1590_s3] sm:$0xf]  ;;  %v1177_v18 = vld [vmem:[%s1590_s3 + $0x4] sm:$0xf]  ;;  %v978_v20 = vor.u32 %v1160_v13, %v977_v12  ;;  %v982_v21 = vor.u32 %v1159_v14, %v979_v15  ;;  %v708_v26 = vld [vmem:[%s1591_s5 + $0x8] sm:$0xff] }
  0x1d   :  { %357 = vmatpush.bf16.msra.mxu3 %v1134_v27  ;;  %v1050_v22 = vor.u32 %v1178_v17, %v1049_v16  ;;  %v1054_v23 = vor.u32 %v1177_v18, %v1051_v19  ;;  %v707_v27 = vld [vmem:[%s1591_s5] sm:$0xff]  ;;  %v746_v38 = vld [vmem:[%s1592_s6 + $0x18] sm:$0xff]  ;;  %v745_v40 = vld [vmem:[%s1592_s6 + $0x10] sm:$0xff] }
  0x1e   :  { %210 = vmatpush.bf16.msra.mxu0 %v1143_v28  ;;  %v747_v37 = vld [vmem:[%s1592_s6 + $0x20] sm:$0xff]  ;;  %v790_v12 = vld [vmem:[%s1593_s7 + $0x38] sm:$0xff]  ;;  %v789_v13 = vld [vmem:[%s1593_s7 + $0x30] sm:$0xff] }
  0x1f   :  { %224 = vmatpush.bf16.msra.mxu1 %v1151_v29  ;;  %v788_v14 = vld [vmem:[%s1593_s7 + $0x28] sm:$0xff]  ;;  %v787_v15 = vld [vmem:[%s1593_s7 + $0x20] sm:$0xff]  ;;  %v786_v18 = vld [vmem:[%s1593_s7 + $0x18] sm:$0xff] }
  0x20   :  { %344 = vmatpush.bf16.msra.mxu2 %v1125_v30  ;;  %v785_v19 = vld [vmem:[%s1593_s7 + $0x10] sm:$0xff] }
  0x21   :  { %358 = vmatpush.bf16.msra.mxu3 %v1133_v31  ;;  %211 = vmatmul.bf16.vlgmr.msra.gmra.mxu0 %v834_v46 }
  0x22   :  { %505 = vmatpush.bf16.msrb.mxu0 %v1168_v32  ;;  %225 = vmatmul.bf16.vlgmr.msra.gmra.mxu1 %v838_v47  ;;  %v750_v32 = vld [vmem:[%s1592_s6 + $0x38] sm:$0xff] }
  0x23   :  { %519 = vmatpush.bf16.msrb.mxu1 %v1176_v33  ;;  %345 = vmatmul.bf16.vlgmr.msra.gmra.mxu2 %v906_v44  ;;  %v749_v33 = vld [vmem:[%s1592_s6 + $0x30] sm:$0xff] }
  0x24   :  { %675 = vmatpush.bf16.msrb.mxu2 %v1186_v42  ;;  %359 = vmatmul.bf16.vlgmr.msra.gmra.mxu3 %v910_v45  ;;  %v744_v45 = vld [vmem:[%s1592_s6 + $0x8] sm:$0xff] }
  0x25   :  { %689 = vmatpush.bf16.msrb.mxu3 %v1194_v43 }
  0x26   :  { %506 = vmatpush.bf16.msrb.mxu0 %v1167_v48 }
  0x27   :  { %520 = vmatpush.bf16.msrb.mxu1 %v1175_v49 }
  0x28   :  { %676 = vmatpush.bf16.msrb.mxu2 %v1185_v50 }
  0x29   :  { %690 = vmatpush.bf16.msrb.mxu3 %v1193_v51 }
  0x2a   :  { %507 = vmatpush.bf16.msrb.mxu0 %v1166_v52 }
  0x2b   :  { %521 = vmatpush.bf16.msrb.mxu1 %v1174_v53 }
  0x2c   :  { %677 = vmatpush.bf16.msrb.mxu2 %v1184_v54 }
  0x2d   :  { %691 = vmatpush.bf16.msrb.mxu3 %v1192_v55 }
  0x2e   :  { %508 = vmatpush.bf16.msrb.mxu0 %v1165_v56 }
  0x2f   :  { %522 = vmatpush.bf16.msrb.mxu1 %v1173_v57 }
  0x30   :  { %678 = vmatpush.bf16.msrb.mxu2 %v1183_v58 }
  0x31   :  { %692 = vmatpush.bf16.msrb.mxu3 %v1191_v59 }
  0x32   :  { %509 = vmatpush.bf16.msrb.mxu0 %v1164_v60 }
  0x33   :  { %523 = vmatpush.bf16.msrb.mxu1 %v1172_v61 }
  0x34   :  { %679 = vmatpush.bf16.msrb.mxu2 %v1182_v62 }
  0x35   :  { %693 = vmatpush.bf16.msrb.mxu3 %v1190_v63 }
  0x36   :  { %510 = vmatpush.bf16.msrb.mxu0 %v1163_v0 }
  0x37   :  { %524 = vmatpush.bf16.msrb.mxu1 %v1171_v1 }
  0x38   :  { %680 = vmatpush.bf16.msrb.mxu2 %v1181_v2 }
  0x39   :  { %694 = vmatpush.bf16.msrb.mxu3 %v1189_v3  ;;  %v743_v3 = vld [vmem:[%s1592_s6] sm:$0xff] }
  0x3a   :  { %511 = vmatpush.bf16.msrb.mxu0 %v1162_v4  ;;  %v798_v4 = vld [vmem:[%s1593_s7 + $0x78] sm:$0xff] }
  0x3b   :  { %525 = vmatpush.bf16.msrb.mxu1 %v1170_v5  ;;  %v797_v5 = vld [vmem:[%s1593_s7 + $0x70] sm:$0xff] }
  0x3c   :  { %681 = vmatpush.bf16.msrb.mxu2 %v1180_v6  ;;  %v796_v6 = vld [vmem:[%s1593_s7 + $0x68] sm:$0xff] }
  0x3d   :  { %695 = vmatpush.bf16.msrb.mxu3 %v1188_v7  ;;  %v795_v7 = vld [vmem:[%s1593_s7 + $0x60] sm:$0xff] }
  0x3e   :  { %512 = vmatpush.bf16.msrb.mxu0 %v1161_v8  ;;  %v794_v8 = vld [vmem:[%s1593_s7 + $0x58] sm:$0xff] }
  0x3f   :  { %526 = vmatpush.bf16.msrb.mxu1 %v1169_v9  ;;  %v793_v9 = vld [vmem:[%s1593_s7 + $0x50] sm:$0xff] }
  0x40   :  { %682 = vmatpush.bf16.msrb.mxu2 %v1179_v10  ;;  %v792_v10 = vld [vmem:[%s1593_s7 + $0x48] sm:$0xff] }
  0x41   :  { %696 = vmatpush.bf16.msrb.mxu3 %v1187_v11  ;;  %513 = vmatmul.bf16.vlgmr.msrb.gmra.mxu0 %v978_v20  ;;  %v791_v11 = vld [vmem:[%s1593_s7 + $0x40] sm:$0xff] }
  0x42   :  { %527 = vmatmul.bf16.vlgmr.msrb.gmra.mxu1 %v982_v21  ;;  %730 = vmatpush.msra.mxu0 %v710_v24 }
  0x43   :  { %683 = vmatmul.bf16.vlgmr.msrb.gmra.mxu2 %v1050_v22  ;;  %766 = vmatpush.msra.mxu1 %v750_v32  ;;  %v784_v22 = vld [vmem:[%s1593_s7 + $0x8] sm:$0xff] }
  0x44   :  { %697 = vmatmul.bf16.vlgmr.msrb.gmra.mxu3 %v1054_v23  ;;  %731 = vmatpush.msra.mxu0 %v709_v25  ;;  %v783_v23 = vld [vmem:[%s1593_s7] sm:$0xff] }
  0x45   :  { %767 = vmatpush.msra.mxu1 %v749_v33  ;;  %799 = vmatpush.msra.mxu2 %v798_v4 }
  0x46   :  { %732 = vmatpush.msra.mxu0 %v708_v26  ;;  %1195 = vmatpush.msra.mxu3 %v798_v4 }
  0x47   :  { %768 = vmatpush.msra.mxu1 %v748_v36  ;;  %800 = vmatpush.msra.mxu2 %v797_v5 }
  0x48   :  { %733 = vmatpush.msra.mxu0 %v707_v27  ;;  %1196 = vmatpush.msra.mxu3 %v797_v5 }
  0x49   :  { %769 = vmatpush.msra.mxu1 %v747_v37  ;;  %801 = vmatpush.msra.mxu2 %v796_v6 }
  0x4a   :  { %1197 = vmatpush.msra.mxu3 %v796_v6 }
  0x4b   :  { %770 = vmatpush.msra.mxu1 %v746_v38  ;;  %802 = vmatpush.msra.mxu2 %v795_v7 }
  0x4c   :  { %1198 = vmatpush.msra.mxu3 %v795_v7 }
  0x4d   :  { %771 = vmatpush.msra.mxu1 %v745_v40  ;;  %803 = vmatpush.msra.mxu2 %v794_v8 }
  0x4e   :  { %1199 = vmatpush.msra.mxu3 %v794_v8 }
  0x4f   :  { %772 = vmatpush.msra.mxu1 %v744_v45  ;;  %804 = vmatpush.msra.mxu2 %v793_v9 }
  0x50   :  { %1200 = vmatpush.msra.mxu3 %v793_v9 }
  0x51   :  { %773 = vmatpush.msra.mxu1 %v743_v3  ;;  %805 = vmatpush.msra.mxu2 %v792_v10 }
  0x52   :  { %1201 = vmatpush.msra.mxu3 %v792_v10 }
  0x53   :  { %806 = vmatpush.msra.mxu2 %v791_v11 }
  0x54   :  { %1202 = vmatpush.msra.mxu3 %v791_v11 }
  0x55   :  { %807 = vmatpush.msra.mxu2 %v790_v12 }
  0x56   :  { %1203 = vmatpush.msra.mxu3 %v790_v12 }
  0x57   :  { %808 = vmatpush.msra.mxu2 %v789_v13 }
  0x58   :  { %1204 = vmatpush.msra.mxu3 %v789_v13 }
  0x59   :  { %809 = vmatpush.msra.mxu2 %v788_v14 }
  0x5a   :  { %1205 = vmatpush.msra.mxu3 %v788_v14 }
  0x5b   :  { %810 = vmatpush.msra.mxu2 %v787_v15 }
  0x5c   :  { %1206 = vmatpush.msra.mxu3 %v787_v15 }
  0x5d   :  { %811 = vmatpush.msra.mxu2 %v786_v18 }
  0x5e   :  { %1207 = vmatpush.msra.mxu3 %v786_v18 }
  0x5f   :  { %812 = vmatpush.msra.mxu2 %v785_v19 }
  0x60   :  { %1208 = vmatpush.msra.mxu3 %v785_v19 }
  0x61   :  { %813 = vmatpush.msra.mxu2 %v784_v22 }
  0x62   :  { %1209 = vmatpush.msra.mxu3 %v784_v22 }
  0x63   :  { %814 = vmatpush.msra.mxu2 %v783_v23 }
  0x64   :  { %1210 = vmatpush.msra.mxu3 %v783_v23 }
  0x9e   :  { %v212_v28 = vpop.f32.mrf.mxu0 }
  0x9f   :  { %v226_v29 = vpop.f32.mrf.mxu1 }
  0xa0   :  { %v227_v39 = vadd.f32 %v226_v29, %v212_v28 }
  0xa6   :  { %v346_v30 = vpop.f32.mrf.mxu2  ;;  %v214_v34 = vpop.f32.mrf.mxu0 }
  0xa7   :  { %v360_v31 = vpop.f32.mrf.mxu3  ;;  %v228_v35 = vpop.f32.mrf.mxu1  ;;  %v347_v46 = vadd.f32 %v346_v30, %v227_v39 }
  0xa8   :  { %v229_v49 = vadd.f32 %v228_v35, %v214_v34 }
  0xa9   :  { %v361_v48 = vadd.f32 %v360_v31, %v347_v46 }
  0xae   :  { %v348_v41 = vpop.f32.mrf.mxu2 }
  0xaf   :  { %v362_v42 = vpop.f32.mrf.mxu3  ;;  %v349_v56 = vadd.f32 %v348_v41, %v229_v49 }
  0xb1   :  { %v363_v60 = vadd.f32 %v362_v42, %v349_v56 }
  0xbe   :  { %v514_v43 = vpop.f32.mrf.mxu0 }
  0xbf   :  { %v528_v44 = vpop.f32.mrf.mxu1 }
  0xc0   :  { %v529_v47 = vadd.f32 %v528_v44, %v514_v43 }
  0xc2   :  { %v533_v52 = vadd.f32 %v529_v47, %v361_v48 }
  0xc6   :  { %v684_v50 = vpop.f32.mrf.mxu2  ;;  %v516_v54 = vpop.f32.mrf.mxu0 }
  0xc7   :  { %v698_v51 = vpop.f32.mrf.mxu3  ;;  %v530_v55 = vpop.f32.mrf.mxu1 }
  0xc8   :  { %v699_v53 = vadd.f32 %v698_v51, %v684_v50  ;;  %v531_v59 = vadd.f32 %v530_v55, %v516_v54 }
  0xca   :  { %v703_v57 = vadd.f32 %v699_v53, %v533_v52  ;;  %v534_v63 = vadd.f32 %v531_v59, %v363_v60 }
  0xcc   :  { %v705_v58 = vmax.f32 %v703_v57, 0.0 }
  0xce   :  { %1119 = vmatmul.msk.f32.vlgmr.msra.gmra.mxu0 %vm711_vm0, %v705_v58  ;;  %v686_v61 = vpop.f32.mrf.mxu2 }
  0xcf   :  { %v700_v62 = vpop.f32.mrf.mxu3 }
  0xd0   :  { %v701_v0 = vadd.f32 %v700_v62, %v686_v61 }
  0xd2   :  { %v704_v1 = vadd.f32 %v701_v0, %v534_v63 }
  0xd4   :  { %v706_v2 = vmax.f32 %v704_v1, 0.0 }
  0xd6   :  { %1120 = vmatmul.msk.f32.gmra.mxu0 %vm711_vm0, %v706_v2 }
 0x14b   :  { %v735_v16 = vpop.f32.mrf.mxu0 }
 0x14c   :  { %v741_v17 = vmax.f32 %v735_v16, 0.0 }
 0x14e   :  { %1121 = vmatmul.msk.f32.vlgmr.msra.gmra.mxu1 %vm751_vm1, %v741_v17 }
 0x153   :  { %v738_v20 = vpop.f32.mrf.mxu0 }
 0x154   :  { %v742_v21 = vmax.f32 %v738_v20, 0.0 }
 0x156   :  { %1122 = vmatmul.msk.f32.gmra.mxu1 %vm751_vm1, %v742_v21 }
 0x1cb   :  { %v775_v24 = vpop.f32.mrf.mxu1 }
 0x1cc   :  { %v781_v25 = vmax.f32 %v775_v24, 0.0 }
 0x1ce   :  { %815 = vmatmul.f32.vlgmr.msra.gmra.mxu2 %v781_v25 }
 0x1d3   :  { %v778_v26 = vpop.f32.mrf.mxu1 }
 0x1d4   :  { %v782_v27 = vmax.f32 %v778_v26, 0.0 }
 0x1d6   :  { %818 = vmatmul.f32.vlgmr.msra.gmra.mxu3 %v782_v27 }
 0x251   :  { %v816_v28 = vpop.f32.mrf.mxu2 }
 0x252   :  { %v822_v29 = vmax.f32 %v816_v28, 0.0 }
 0x254   :  { %825 = vst.msk [vmem:[%s1594_s8] sm:$0xff] %vm824_vm2, %v822_v29 }
 0x259   :  { %v819_v30 = vpop.f32.mrf.mxu3 }
 0x25a   :  { %v823_v31 = vmax.f32 %v819_v30, 0.0 }
 0x25c   :  { %826 = vst.msk [vmem:[%s1594_s8 + $0x8] sm:$0xff] %vm824_vm2, %v823_v31 }

</bundles_post_ra>
